<compile_context>
chip_gen: v5e
topology: v5e:2x2
jax: 0.10.0
libtpu: 0.0.40
codegen_flags: <defaults>
</compile_context>

<pallas_src>
import math

import jax
import jax.numpy as jnp
from jax.experimental import pallas as pl
from jax.experimental.pallas import tpu as pltpu

_QMAX = 127.0                 # 8-bit, narrow_range=True (bounds [-127, 127])
_INV_SQRT2 = 1.0 / 1.41421    # matches the module's erf(x / 1.41421)
_AMAX_EPS = 1e-12             # guard against zero amax (dead channel) -> no NaN/inf

# Abramowitz & Stegun 7.1.26 erf polynomial constants (|abs err| < 1.5e-7).
_P = 0.3275911
_A1, _A2, _A3, _A4, _A5 = 0.254829592, -0.284496736, 1.421413741, -1.453152027, 1.061405429


def _erf_in_kernel(x):
    # TODO(synk): lax.erf has no direct Mosaic lowering; polynomial approximation used.
    sgn = jnp.where(x < 0.0, -1.0, 1.0)
    z = jnp.abs(x)
    t = pl.reciprocal(1.0 + _P * z, approx=True)      # EUP, frees VALU slots
    poly = ((((_A5 * t + _A4) * t + _A3) * t + _A2) * t + _A1) * t
    return sgn * (1.0 - poly * jnp.exp(-z * z))       # exp -> EUP


def _linear_act_kernel(scal_ref, x_ref, w_ref, b_ref, cscale_ref, o_ref, acc_ref):
    """scal_ref (SMEM, (3,)): [inv_scale_in, inv_scale_gemm, dequant_gemm]."""
    k = pl.program_id(2)

    @pl.when(k == 0)
    def _():
        acc_ref[...] = jnp.zeros_like(acc_ref)

    # Input quantizer (per-tensor): integer codes, exact in bf16 -> full-rate MXU matmul.
    inv_in = scal_ref[0]
    xq = jnp.clip(jnp.round(x_ref[...] * inv_in), -_QMAX, _QMAX).astype(jnp.bfloat16)
    acc_ref[...] += jnp.dot(xq, w_ref[...], preferred_element_type=jnp.float32)

    @pl.when(k == pl.num_programs(2) - 1)
    def _():
        inv_gemm = scal_ref[1]
        dq_gemm = scal_ref[2]
        # Fused dequant: per-output-channel (amax_in/127)*(amax_w[j]/127), lane broadcast.
        y = acc_ref[...] * cscale_ref[...]
        # After-gemm quantizer (per-tensor).
        yq = jnp.clip(jnp.round(y * inv_gemm), -_QMAX, _QMAX) * dq_gemm
        # bias_gelu(bias, y): z = bias + y ; z * 0.5 * (1 + erf(z / 1.41421))
        z = b_ref[...] + yq
        o_ref[...] = (z * 0.5 * (1.0 + _erf_in_kernel(z * _INV_SQRT2))).astype(o_ref.dtype)


def _pick_tile(dim, target, align):
    """Largest multiple of `align` <= target that divides dim, else the full dim."""
    if dim <= target:
        return dim
    t = (target // align) * align
    while t >= align:
        if dim % t == 0:
            return t
        t -= align
    return dim


def linear_activation(x, weight, bias, amax_in, amax_w, amax_gemm,
                      *, tm=None, tn=None, tk=None):
    """Fused quantized linear + bias_gelu. x: (..., K); weight: (N, K); bias: (N,)."""
    lead = x.shape[:-1]
    K = x.shape[-1]
    N = weight.shape[0]
    x2d = x.reshape(-1, K)                       # keep native dtype (no f32 up-cast)
    M = x2d.shape[0]

    # Tile selection: lane/sublane aligned, sized for a 64 MiB (v7x) VMEM budget.
    tm = _pick_tile(M, 256, 8) if tm is None else tm
    tn = _pick_tile(N, 512, 128) if tn is None else tn
    tk = _pick_tile(K, 512, 128) if tk is None else tk
    assert M % tm == 0 and N % tn == 0 and K % tk == 0

    f32 = jnp.float32
    # ---- One-time host-side (XLA) prep: reciprocal scales + pre-quantized weight codes.
    amax_in_s = jnp.maximum(amax_in.astype(f32), _AMAX_EPS)
    amax_gemm_s = jnp.maximum(amax_gemm.astype(f32), _AMAX_EPS)
    amax_w_s = jnp.maximum(amax_w.astype(f32), _AMAX_EPS)        # (N,)

    inv_in = _QMAX / amax_in_s
    inv_gemm = _QMAX / amax_gemm_s
    dq_gemm = amax_gemm_s / _QMAX
    scalars = jnp.stack([inv_in, inv_gemm, dq_gemm]).astype(f32)  # (3,) -> SMEM

    # Per-output-channel weight codes (axis=0 descriptor), transposed to (K, N), bf16.
    w_codes = jnp.clip(jnp.round(weight.astype(f32) * (_QMAX / amax_w_s)[:, None]),
                       -_QMAX, _QMAX)
    w_codes_t = w_codes.T.astype(jnp.bfloat16)                    # (K, N)
    # Fused dequant scale per output channel (includes the input dequant scale).
    comb_scale = ((amax_in_s / _QMAX) * (amax_w_s / _QMAX)).reshape(1, N).astype(f32)
    bias2d = bias.reshape(1, N).astype(f32)

    # VMEM budget: double-buffered x/w/out tiles + accumulator (+ small epilogue rows).
    est = (2 * (tm * tk * x2d.dtype.itemsize + tk * tn * 2 + tm * tn * 4)
           + tm * tn * 4 + 4 * tn * 4)
    vmem_limit = int(min(64 << 20, max(32 << 20, 2 * est)))

    out = pl.pallas_call(
        _linear_act_kernel,
        out_shape=jax.ShapeDtypeStruct((M, N), f32),
        grid=(M // tm, N // tn, K // tk),
        in_specs=[
            pl.BlockSpec(memory_space=pltpu.MemorySpace.SMEM),          # scalars (3,)
            pl.BlockSpec((tm, tk), lambda i, j, k: (i, k)),             # x tile
            pl.BlockSpec((tk, tn), lambda i, j, k: (k, j)),             # weight codes (K,N)
            pl.BlockSpec((1, tn), lambda i, j, k: (0, j)),              # bias
            pl.BlockSpec((1, tn), lambda i, j, k: (0, j)),              # fused dequant scale
        ],
        out_specs=pl.BlockSpec((tm, tn), lambda i, j, k: (i, j)),
        scratch_shapes=[pltpu.VMEM((tm, tn), jnp.float32)],             # f32 accumulator
        compiler_params=pltpu.CompilerParams(
            dimension_semantics=("parallel", "parallel", "arbitrary"),
            vmem_limit_bytes=vmem_limit),
    )(scalars, x2d, w_codes_t, bias2d, comb_scale)
    return out.reshape(*lead, N)


# ----------------------------- pure-JAX reference -----------------------------

def _fake_quant(x, amax):
    scale = _QMAX / amax
    return jnp.clip(jnp.round(x * scale), -_QMAX, _QMAX) / scale


def _reference(x, weight, bias, amax_in, amax_w, amax_gemm):
    x2d = x.reshape(-1, x.shape[-1])
    xq = _fake_quant(x2d, amax_in)
    wq = _fake_quant(weight, amax_w[:, None])
    y = jax.lax.dot_general(xq, wq, (((1,), (1,)), ((), ())),
                            precision=jax.lax.Precision.HIGHEST)
    yq = _fake_quant(y, amax_gemm)
    z = bias[None, :] + yq
    out = z * 0.5 * (1.0 + jax.scipy.special.erf(z / 1.41421))
    return out.reshape(*x.shape[:-1], weight.shape[0])


if __name__ == "__main__":
    batch, seq, in_features, out_features = 2, 8, 32, 64
    key = jax.random.PRNGKey(0)
    kx, kw, kb = jax.random.split(key, 3)

    # Deterministic parameter init mirroring reset_parameters():
    #   kaiming_normal_(a=sqrt(5)) -> std = sqrt(2/(1+5))/sqrt(fan_in) = sqrt(1/(3*fan_in))
    w_std = math.sqrt(1.0 / (3.0 * in_features))
    weight = (w_std * jax.random.normal(kw, (out_features, in_features))).astype(jnp.float32)
    bound = 1.0 / math.sqrt(in_features)
    bias = jax.random.uniform(kb, (out_features,), jnp.float32, -bound, bound)
    x = jax.random.normal(kx, (batch, seq, in_features), jnp.float32)

    # "Calibration" of TensorQuantizer amax values (what a max calibrator would record).
    amax_in = jnp.max(jnp.abs(x))
    amax_w = jnp.max(jnp.abs(weight), axis=1)        # per output channel (axis=0 descriptor)
    xq_cal = _fake_quant(x.reshape(-1, in_features), amax_in)
    wq_cal = _fake_quant(weight, amax_w[:, None])
    y_cal = jax.lax.dot_general(xq_cal, wq_cal, (((1,), (1,)), ((), ())),
                                precision=jax.lax.Precision.HIGHEST)
    amax_gemm = jnp.max(jnp.abs(y_cal))

    out = linear_activation(x, weight, bias, amax_in, amax_w, amax_gemm)
    out = jax.block_until_ready(out)

    ref = _reference(x, weight, bias, amax_in, amax_w, amax_gemm)
    max_diff = float(jnp.max(jnp.abs(out - ref)))
    # Tolerance covers the in-kernel erf polynomial/approx reciprocal (~1e-4) and a rare
    # single quantization-bucket flip from matmul accumulation-order differences.
    assert max_diff < 5e-2, f"max abs diff too large: {max_diff}"
    print("KERNEL_OK")
</pallas_src>

<mosaic_0001>
module attributes {stable_mosaic.version = 11 : i64} {
  func.func @_linear_act_kernel(%arg0: i32, %arg1: i32, %arg2: i32, %arg3: memref<3xf32, #tpu.memory_space<smem>>, %arg4: memref<16x32xf32, #tpu.memory_space<vmem>>, %arg5: memref<32x64xbf16, #tpu.memory_space<vmem>>, %arg6: memref<1x64xf32, #tpu.memory_space<vmem>>, %arg7: memref<1x64xf32, #tpu.memory_space<vmem>>, %arg8: memref<16x64xf32, #tpu.memory_space<vmem>>, %arg9: memref<16x64xf32, #tpu.memory_space<vmem>>) attributes {dimension_semantics = [#tpu.dimension_semantics<parallel>, #tpu.dimension_semantics<parallel>, #tpu.dimension_semantics<arbitrary>], iteration_bounds = array<i64: 1, 1, 1>, scalar_prefetch = 0 : i64, scratch_operands = 1 : i64, tpu.core_type = #tpu.core_type<tc>, window_params = [{transform_indices = @transform_0, window_bounds = array<i64: 3>}, {transform_indices = @transform_1, window_bounds = array<i64: 16, 32>}, {transform_indices = @transform_2, window_bounds = array<i64: 32, 64>}, {transform_indices = @transform_3, window_bounds = array<i64: 1, 64>}, {transform_indices = @transform_4, window_bounds = array<i64: 1, 64>}, {transform_indices = @transform_5, window_bounds = array<i64: 16, 64>}]} {
    %c0_i32 = arith.constant 0 : i32
    %0 = arith.cmpi eq, %arg2, %c0_i32 : i32
    %1 = arith.extui %0 : i1 to i32
    %c0_i32_0 = arith.constant 0 : i32
    %2 = arith.cmpi ne, %1, %c0_i32_0 : i32
    scf.if %2 {
      %cst_13 = arith.constant 0.000000e+00 : f32
      %21 = vector.broadcast %cst_13 : f32 to vector<16x64xf32>
      %c0_14 = arith.constant 0 : index
      %c0_15 = arith.constant 0 : index
      %22 = vector.load %arg9[%c0_14, %c0_15] : memref<16x64xf32, #tpu.memory_space<vmem>>, vector<16x64xf32>
      tpu.vector_store %arg9[%c0_14, %c0_15], %21 {strides = array<i32>} : memref<16x64xf32, #tpu.memory_space<vmem>>, vector<16x64xf32>,
    } else {
    }
    %c0 = arith.constant 0 : index
    %3 = memref.load %arg3[%c0] : memref<3xf32, #tpu.memory_space<smem>>
    %c0_1 = arith.constant 0 : index
    %c0_2 = arith.constant 0 : index
    %4 = vector.load %arg4[%c0_1, %c0_2] : memref<16x32xf32, #tpu.memory_space<vmem>>, vector<16x32xf32>
    %5 = vector.broadcast %3 : f32 to vector<16x32xf32>
    %6 = arith.mulf %4, %5 : vector<16x32xf32>
    %7 = math.roundeven %6 : vector<16x32xf32>
    %cst = arith.constant -1.270000e+02 : f32
    %cst_3 = arith.constant 1.270000e+02 : f32
    %8 = vector.broadcast %cst : f32 to vector<16x32xf32>
    %9 = arith.maximumf %8, %7 : vector<16x32xf32>
    %10 = vector.broadcast %cst_3 : f32 to vector<16x32xf32>
    %11 = arith.minimumf %10, %9 : vector<16x32xf32>
    %12 = arith.truncf %11 : vector<16x32xf32> to vector<16x32xbf16>
    %c0_4 = arith.constant 0 : index
    %c0_5 = arith.constant 0 : index
    %13 = vector.load %arg9[%c0_4, %c0_5] : memref<16x64xf32, #tpu.memory_space<vmem>>, vector<16x64xf32>
    %c0_6 = arith.constant 0 : index
    %c0_7 = arith.constant 0 : index
    %14 = vector.load %arg5[%c0_6, %c0_7] : memref<32x64xbf16, #tpu.memory_space<vmem>>, vector<32x64xbf16>
    %cst_8 = arith.constant dense<0.000000e+00> : vector<16x64xf32>
    %15 = tpu.matmul %12, %14, %cst_8 {dimension_numbers = #tpu.dot_dimension_numbers<[1], [0], [0], [1], [0, 0, 1, 1], [], []>} : vector<16x32xbf16>, vector<32x64xbf16>, vector<16x64xf32> -> vector<16x64xf32>
    %16 = arith.addf %13, %15 : vector<16x64xf32>
    %c0_9 = arith.constant 0 : index
    %c0_10 = arith.constant 0 : index
    %17 = vector.load %arg9[%c0_9, %c0_10] : memref<16x64xf32, #tpu.memory_space<vmem>>, vector<16x64xf32>
    tpu.vector_store %arg9[%c0_9, %c0_10], %16 {strides = array<i32>} : memref<16x64xf32, #tpu.memory_space<vmem>>, vector<16x64xf32>,
    %c0_i32_11 = arith.constant 0 : i32
    %18 = arith.cmpi eq, %arg2, %c0_i32_11 : i32
    %19 = arith.extui %18 : i1 to i32
    %c0_i32_12 = arith.constant 0 : i32
    %20 = arith.cmpi ne, %19, %c0_i32_12 : i32
    scf.if %20 {
      %c1 = arith.constant 1 : index
      %21 = memref.load %arg3[%c1] : memref<3xf32, #tpu.memory_space<smem>>
      %c2 = arith.constant 2 : index
      %22 = memref.load %arg3[%c2] : memref<3xf32, #tpu.memory_space<smem>>
      %c0_13 = arith.constant 0 : index
      %c0_14 = arith.constant 0 : index
      %23 = vector.load %arg9[%c0_13, %c0_14] : memref<16x64xf32, #tpu.memory_space<vmem>>, vector<16x64xf32>
      %c0_15 = arith.constant 0 : index
      %c0_16 = arith.constant 0 : index
      %24 = vector.load %arg7[%c0_15, %c0_16] : memref<1x64xf32, #tpu.memory_space<vmem>>, vector<1x64xf32>
      %25 = vector.broadcast %24 : vector<1x64xf32> to vector<16x64xf32>
      %26 = arith.mulf %23, %25 : vector<16x64xf32>
      %27 = vector.broadcast %21 : f32 to vector<16x64xf32>
      %28 = arith.mulf %26, %27 : vector<16x64xf32>
      %29 = math.roundeven %28 : vector<16x64xf32>
      %cst_17 = arith.constant -1.270000e+02 : f32
      %cst_18 = arith.constant 1.270000e+02 : f32
      %30 = vector.broadcast %cst_17 : f32 to vector<16x64xf32>
      %31 = arith.maximumf %30, %29 : vector<16x64xf32>
      %32 = vector.broadcast %cst_18 : f32 to vector<16x64xf32>
      %33 = arith.minimumf %32, %31 : vector<16x64xf32>
      %34 = vector.broadcast %22 : f32 to vector<16x64xf32>
      %35 = arith.mulf %33, %34 : vector<16x64xf32>
      %c0_19 = arith.constant 0 : index
      %c0_20 = arith.constant 0 : index
      %36 = vector.load %arg6[%c0_19, %c0_20] : memref<1x64xf32, #tpu.memory_space<vmem>>, vector<1x64xf32>
      %37 = vector.broadcast %36 : vector<1x64xf32> to vector<16x64xf32>
      %38 = arith.addf %37, %35 : vector<16x64xf32>
      %cst_21 = arith.constant 5.000000e-01 : f32
      %39 = vector.broadcast %cst_21 : f32 to vector<16x64xf32>
      %40 = arith.mulf %38, %39 : vector<16x64xf32>
      %cst_22 = arith.constant 0.707108557 : f32
      %41 = vector.broadcast %cst_22 : f32 to vector<16x64xf32>
      %42 = arith.mulf %38, %41 : vector<16x64xf32>
      %cst_23 = arith.constant 0.000000e+00 : f32
      %43 = vector.broadcast %cst_23 : f32 to vector<16x64xf32>
      %44 = arith.cmpf olt, %42, %43 : vector<16x64xf32>
      %cst_24 = arith.constant -1.000000e+00 : f32
      %cst_25 = arith.constant 1.000000e+00 : f32
      %45 = vector.broadcast %cst_24 : f32 to vector<16x64xf32>
      %46 = vector.broadcast %cst_25 : f32 to vector<16x64xf32>
      %47 = arith.select %44, %45, %46 : vector<16x64xi1>, vector<16x64xf32>
      %48 = math.absf %42 : vector<16x64xf32>
      %cst_26 = arith.constant 0.327591091 : f32
      %49 = vector.broadcast %cst_26 : f32 to vector<16x64xf32>
      %50 = arith.mulf %49, %48 : vector<16x64xf32>
      %cst_27 = arith.constant 1.000000e+00 : f32
      %51 = vector.broadcast %cst_27 : f32 to vector<16x64xf32>
      %52 = arith.addf %51, %50 : vector<16x64xf32>
      %53 = tpu.reciprocal %52 {approx = true} : vector<16x64xf32> -> vector<16x64xf32>
      %cst_28 = arith.constant 1.06140542 : f32
      %54 = vector.broadcast %cst_28 : f32 to vector<16x64xf32>
      %55 = arith.mulf %54, %53 : vector<16x64xf32>
      %cst_29 = arith.constant -1.45315206 : f32
      %56 = vector.broadcast %cst_29 : f32 to vector<16x64xf32>
      %57 = arith.addf %55, %56 : vector<16x64xf32>
      %58 = arith.mulf %57, %53 : vector<16x64xf32>
      %cst_30 = arith.constant 1.42141378 : f32
      %59 = vector.broadcast %cst_30 : f32 to vector<16x64xf32>
      %60 = arith.addf %58, %59 : vector<16x64xf32>
      %61 = arith.mulf %60, %53 : vector<16x64xf32>
      %cst_31 = arith.constant -0.284496725 : f32
      %62 = vector.broadcast %cst_31 : f32 to vector<16x64xf32>
      %63 = arith.addf %61, %62 : vector<16x64xf32>
      %64 = arith.mulf %63, %53 : vector<16x64xf32>
      %cst_32 = arith.constant 0.254829586 : f32
      %65 = vector.broadcast %cst_32 : f32 to vector<16x64xf32>
      %66 = arith.addf %64, %65 : vector<16x64xf32>
      %67 = arith.mulf %66, %53 : vector<16x64xf32>
      %cst_33 = arith.constant 0.000000e+00 : f32
      %68 = vector.broadcast %cst_33 : f32 to vector<16x64xf32>
      %69 = arith.subf %68, %48 : vector<16x64xf32>
      %70 = arith.mulf %69, %48 : vector<16x64xf32>
      %71 = math.exp %70 : vector<16x64xf32>
      %72 = arith.mulf %67, %71 : vector<16x64xf32>
      %cst_34 = arith.constant 1.000000e+00 : f32
      %73 = vector.broadcast %cst_34 : f32 to vector<16x64xf32>
      %74 = arith.subf %73, %72 : vector<16x64xf32>
      %75 = arith.mulf %47, %74 : vector<16x64xf32>
      %cst_35 = arith.constant 1.000000e+00 : f32
      %76 = vector.broadcast %cst_35 : f32 to vector<16x64xf32>
      %77 = arith.addf %76, %75 : vector<16x64xf32>
      %78 = arith.mulf %40, %77 : vector<16x64xf32>
      %c0_36 = arith.constant 0 : index
      %c0_37 = arith.constant 0 : index
      %79 = vector.load %arg8[%c0_36, %c0_37] : memref<16x64xf32, #tpu.memory_space<vmem>>, vector<16x64xf32>
      tpu.vector_store %arg8[%c0_36, %c0_37], %78 {strides = array<i32>} : memref<16x64xf32, #tpu.memory_space<vmem>>, vector<16x64xf32>,
    } else {
    }
    return
  }
  func.func @transform_0(%arg0: i32, %arg1: i32, %arg2: i32) -> i32 {
    %c0_i32 = arith.constant 0 : i32
    %c0_i32_0 = arith.constant 0 : i32
    return %c0_i32 : i32
  }
  func.func @transform_1(%arg0: i32, %arg1: i32, %arg2: i32) -> (i32, i32) {
    %c0_i32 = arith.constant 0 : i32
    return %arg0, %arg2 : i32, i32
  }
  func.func @transform_2(%arg0: i32, %arg1: i32, %arg2: i32) -> (i32, i32) {
    %c0_i32 = arith.constant 0 : i32
    return %arg2, %arg1 : i32, i32
  }
  func.func @transform_3(%arg0: i32, %arg1: i32, %arg2: i32) -> (i32, i32) {
    %c0_i32 = arith.constant 0 : i32
    %c0_i32_0 = arith.constant 0 : i32
    return %c0_i32, %arg1 : i32, i32
  }
  func.func @transform_4(%arg0: i32, %arg1: i32, %arg2: i32) -> (i32, i32) {
    %c0_i32 = arith.constant 0 : i32
    %c0_i32_0 = arith.constant 0 : i32
    return %c0_i32, %arg1 : i32, i32
  }
  func.func @transform_5(%arg0: i32, %arg1: i32, %arg2: i32) -> (i32, i32) {
    %c0_i32 = arith.constant 0 : i32
    return %arg0, %arg1 : i32, i32
  }
}

</mosaic_0001>

<bundles_post_ra>
// kernel: tpu_custom_call.1
= control target key start
LH: loop header
LB: loop body
LE: loop exit
PB: predicated region body
PF: predicated region fallthrough
CT: control target
= control target key end

     0   :  { %10 = vsyncpa [#allocation6], 0  ;;  %s465_s0 = inlined_call_operand.hbm [shape: f32[3], index: 0, kind: input, shape index: {}]   ;;  %s466_s1 = inlined_call_operand.hbm [shape: f32[16,32], index: 1, kind: input, shape index: {}]   ;;  %s467_s2 = inlined_call_operand.hbm [shape: bf16[32,64], index: 2, kind: input, shape index: {}]   ;;  %s468_s3 = inlined_call_operand.vmem [shape: f32[1,64], index: 3, kind: input, shape index: {}]   ;;  %s469_s4 = inlined_call_operand.vmem [shape: f32[1,64], index: 4, kind: input, shape index: {}]   ;;  %s470_s5 = inlined_call_operand.hbm [shape: f32[16,64], index: 5, kind: output, shape index: {}]  }
   0x1   :  { %11 = vsyncpa [#allocation4], 0 }
   0x2   :  { %12 = vsyncpa [#allocation9], 0 }
   0x3   :  { %13 = vsyncpa [#allocation5], 0  ;;  %s19_s20 = sshll.u32 %s465_s0, 4  ;;  %s27_s23 = sshll.u32 %s466_s1, 4  ;;  %s20_s20 = int_to_ptr.hbm [resolvable:$true] %s19_s20  ;;  %s28_s23 = int_to_ptr.hbm [resolvable:$true] %s27_s23 }
   0x4   :  { %s395_s24 = smov [#allocation3]   ;;  %s396_s25 = smov [#allocation7]  }
   0x5   :  { %22 = dma.hbm_to_smem %s20_s20, 16, %s395_s24, [#allocation6]  }
   0x6   :  { %s29_s26 = sshll.u32 %s396_s25, 4  ;;  %s397_s27 = smov 128   ;;  %s30_s26 = int_to_ptr.vmem [resolvable:$true] %s29_s26 }
   0x7   :  { %s398_s28 = smov 8   ;;  %s40_s0 = sshll.u32 %s467_s2, 4  ;;  %s41_s0 = int_to_ptr.hbm [resolvable:$true] %s40_s0 }
   0x8   :  { %35 = dma.hbm_to_vmem [thread:$0]  %s28_s23, 256, %s30_s26, [#allocation4], %s397_s27, %s397_s27, %s398_s28  }
   0x9   :  { %s399_s6 = smov [#allocation8]   ;;  %s400_s1 = smov 64  }
   0xa   :  { %s42_s7 = sshll.u32 %s399_s6, 4  ;;  %s401_s8 = smov 4   ;;  %s43_s7 = int_to_ptr.vmem [resolvable:$true] %s42_s7 }
   0xb   :  { %48 = dma.hbm_to_vmem [thread:$0]  %s41_s0, 256, %s43_s7, [#allocation9], %s400_s1, %s400_s1, %s401_s8  }
   0xc   :  { %387 = dma.done.wait [#allocation6], 16  }
   0xd   :  { %388 = vsyncadd [#allocation6], 4294967280 }
   0xe   :  { %389 = dma.done.wait [#allocation4], 256  }
   0xf   :  { %390 = vsyncadd [#allocation4], 4294967040 }
  0x10   :  { %391 = dma.done.wait [#allocation9], 256  }
  0x11   :  { %392 = vsyncadd [#allocation9], 4294967040 }
  0x12   :  { %65 = sfence }
  0x13   :  { %v250_v0 = vld [vmem:[#allocation8 + $0x8] sm:$0xff]  ;;  %s74_s9 = sld [smem:[#allocation3]]  ;;  %vm71_vm0 = vcmask 523264   ;;  %v249_v1 = vld [vmem:[#allocation8] sm:$0xff]  ;;  %v402_v2 = vmov 0.0   ;;  %v75_v3 = vld [vmem:[#allocation7] sm:$0xff] }
  0x14   :  { %115 = vmatpush.bf16.msra.mxu0 %v250_v0  ;;  %72 = vst.msk [vmem:[#allocation2] sm:$0xff] %vm71_vm0, %v402_v2  ;;  %v76_v4 = vld [vmem:[#allocation7 + $0x8] sm:$0xff]  ;;  %vm105_vm3 = vcmask 261120   ;;  %s245_s2 = sld [smem:[#allocation3 + $0x1]]  ;;  %v293_v29 = vld [vmem:[%s469_s4] ss:$0 sm:$0xff] }
  0x15   :  { %73 = vst.msk [vmem:[#allocation2 + $0x8] sm:$0xff] %vm71_vm0, %v402_v2  ;;  %s246_s12 = sld [smem:[#allocation3 + $0x2]]  ;;  %v294_v49 = vld [vmem:[%s468_s3] ss:$0 sm:$0xff]  ;;  %s404_s3 = smov [#allocation10]  }
  0x16   :  { %s217_s14 = sshll.u32 %s404_s3, 4  ;;  %s219_s17 = sshll.u32 %s470_s5, 4  ;;  %s218_s14 = int_to_ptr.vmem [resolvable:$true] %s217_s14  ;;  %s220_s17 = int_to_ptr.hbm [resolvable:$true] %s219_s17 }
  0x18   :  { %116 = vmatpush.bf16.msra.mxu0 %v249_v1 }
  0x19   :  { %v77_v5 = vstv %s74_s9 }
  0x1a   :  { %v78_v6 = vmul.f32 %v77_v5, %v75_v3  ;;  %v79_v7 = vmul.f32 %v77_v5, %v76_v4  ;;  %v141_v33 = vstv %s245_s2 }
  0x1b   :  { %v87_v25 = vld [vmem:[#allocation2] sm:$0xff]  ;;  %v150_v47 = vstv %s246_s12 }
  0x1c   :  { %v253_v8 = vcvt.f32.s32 %v78_v6  ;;  %v251_v9 = vand.u32 2147483647, %v78_v6  ;;  %v261_v10 = vcvt.f32.s32 %v79_v7  ;;  %v256_v12 = vand.u32 2147483648, %v78_v6  ;;  %v88_v28 = vld [vmem:[#allocation2 + $0x8] sm:$0xff] }
  0x1d   :  { %v259_v13 = vand.u32 2147483647, %v79_v7  ;;  %v264_v15 = vand.u32 2147483648, %v79_v7 }
  0x1e   :  { %v254_v11 = vcvt.s32.f32 %v253_v8  ;;  %v262_v14 = vcvt.s32.f32 %v261_v10  ;;  %vm252_vm1 = vcmp.lt.f32.partialorder %v251_v9, 8388608.0 }
  0x1f   :  { %vm260_vm2 = vcmp.lt.f32.partialorder %v259_v13, 8388608.0 }
  0x20   :  { %v255_v16 = vand.u32 2147483647, %v254_v11  ;;  %v263_v17 = vand.u32 2147483647, %v262_v14 }
  0x22   :  { %v257_v18 = vor.u32 %v256_v12, %v255_v16  ;;  %v265_v19 = vor.u32 %v264_v15, %v263_v17 }
  0x24   :  { %v258_v20 = vsel %vm252_vm1, %v257_v18, %v78_v6  ;;  %v266_v21 = vsel %vm260_vm2, %v265_v19, %v79_v7 }
  0x25   :  { %v234_v22 = vclamps-f32 %v258_v20, 127.0  ;;  %v235_v23 = vclamps-f32 %v266_v21, 127.0 }
  0x27   :  { %v86_v24 = vpack.c.bf16 %v235_v23, %v234_v22 }
  0x29   :  { %244 = vmatmul.msk.bf16.vlgmr.msra.gmra.mxu0 %vm105_vm3, %v86_v24 }
  0xa6   :  { %v118_v26 = vpop.f32.mrf.mxu0 }
  0xa7   :  { %v123_v27 = vadd.f32 %v118_v26, %v87_v25 }
  0xa9   :  { %126 = vst.msk [vmem:[#allocation2] sm:$0xff] %vm71_vm0, %v123_v27 }
  0xae   :  { %v120_v30 = vpop.f32.mrf.mxu0 }
  0xaf   :  { %v124_v31 = vadd.f32 %v120_v30, %v88_v28 }
  0xb0   :  { %v133_v32 = vld [vmem:[#allocation2] sm:$0xff] }
  0xb1   :  { %127 = vst.msk [vmem:[#allocation2 + $0x8] sm:$0xff] %vm71_vm0, %v124_v31  ;;  %v139_v34 = vmul.f32 %v293_v29, %v133_v32  ;;  %v403_v32 = vmov 1.0  }
  0xb3   :  { %v142_v35 = vmul.f32 %v141_v33, %v139_v34 }
  0xb5   :  { %v269_v36 = vcvt.f32.s32 %v142_v35  ;;  %v267_v39 = vand.u32 2147483647, %v142_v35  ;;  %v272_v42 = vand.u32 2147483648, %v142_v35 }
  0xb7   :  { %v270_v37 = vcvt.s32.f32 %v269_v36  ;;  %vm268_vm4 = vcmp.lt.f32.partialorder %v267_v39, 8388608.0 }
  0xb8   :  { %v134_v38 = vld [vmem:[#allocation2 + $0x8] sm:$0xff] }
  0xb9   :  { %v140_v40 = vmul.f32 %v293_v29, %v134_v38  ;;  %v271_v41 = vand.u32 2147483647, %v270_v37 }
  0xbb   :  { %v143_v43 = vmul.f32 %v141_v33, %v140_v40  ;;  %v273_v44 = vor.u32 %v272_v42, %v271_v41 }
  0xbd   :  { %v274_v45 = vsel %vm268_vm4, %v273_v44, %v142_v35  ;;  %v277_v46 = vcvt.f32.s32 %v143_v43  ;;  %v275_v51 = vand.u32 2147483647, %v143_v43  ;;  %v280_v54 = vand.u32 2147483648, %v143_v43 }
  0xbe   :  { %v247_v48 = vclamps-f32 %v274_v45, 127.0 }
  0xbf   :  { %v278_v50 = vcvt.s32.f32 %v277_v46  ;;  %vm276_vm5 = vcmp.lt.f32.partialorder %v275_v51, 8388608.0 }
  0xc0   :  { %v151_v52 = vmul.f32 %v247_v48, %v150_v47 }
  0xc1   :  { %v279_v53 = vand.u32 2147483647, %v278_v50 }
  0xc2   :  { %v157_v55 = vadd.f32 %v294_v49, %v151_v52 }
  0xc3   :  { %v281_v56 = vor.u32 %v280_v54, %v279_v53 }
  0xc4   :  { %v161_v57 = vmul.f32 0.70710856, %v157_v55  ;;  %v159_v36 = vmul.f32 0.5, %v157_v55 }
  0xc5   :  { %v282_v58 = vsel %vm276_vm5, %v281_v56, %v143_v43 }
  0xc6   :  { %v248_v59 = vclamps-f32 %v282_v58, 127.0  ;;  %v167_v60 = vand.u32 2147483647, %v161_v57  ;;  %vm163_vm6 = vcmp.lt.f32.partialorder %v161_v57, 0.0 }
  0xc7   :  { %v165_v33 = vsel %vm163_vm6, -1.0, %v403_v32 }
  0xc8   :  { %v152_v61 = vmul.f32 %v248_v59, %v150_v47  ;;  %v169_v62 = vmul.f32 0.3275911, %v167_v60  ;;  %v193_v6 = vsub.f32 0.0, %v167_v60 }
  0xca   :  { %v158_v63 = vadd.f32 %v294_v49, %v152_v61  ;;  %v171_v0 = vadd.f32 1.0, %v169_v62  ;;  %v195_v9 = vmul.f32 %v193_v6, %v167_v60 }
  0xcc   :  { %v162_v1 = vmul.f32 0.70710856, %v158_v63  ;;  %295 = vrcp.f32 %v171_v0  ;;  %v197_v14 = vmul.f32 1.442695, %v195_v9  ;;  %v160_v45 = vmul.f32 0.5, %v158_v63 }
  0xce   :  { %v168_v2 = vand.u32 2147483647, %v162_v1  ;;  %vm164_vm7 = vcmp.lt.f32.partialorder %v162_v1, 0.0 }
  0xcf   :  { %v166_v43 = vsel %vm164_vm7, -1.0, %v403_v32 }
  0xd0   :  { %v170_v3 = vmul.f32 0.3275911, %v168_v2  ;;  %v194_v13 = vsub.f32 0.0, %v168_v2 }
  0xd2   :  { %v296_v4 = vpop.eup %295  ;;  %v172_v5 = vadd.f32 1.0, %v170_v3  ;;  %v196_v19 = vmul.f32 %v194_v13, %v168_v2 }
  0xd3   :  { %v175_v7 = vmul.f32 1.0614054, %v296_v4 }
  0xd4   :  { %297 = vrcp.f32 %v172_v5  ;;  %v199_v24 = vmul.f32 1.442695, %v196_v19 }
  0xd5   :  { %v177_v8 = vadd.f32 -1.4531521, %v175_v7  ;;  %299 = vpow2.f32 %v197_v14 }
  0xd6   :  { %301 = vpow2.f32 %v199_v24 }
  0xd7   :  { %v179_v10 = vmul.f32 %v296_v4, %v177_v8 }
  0xd9   :  { %v181_v11 = vadd.f32 1.4214138, %v179_v10 }
  0xda   :  { %v298_v12 = vpop.eup %297 }
  0xdb   :  { %v176_v15 = vmul.f32 1.0614054, %v298_v12  ;;  %v183_v16 = vmul.f32 %v296_v4, %v181_v11  ;;  %v300_v27 = vpop.eup %299 }
  0xdc   :  { %v302_v39 = vpop.eup %301 }
  0xdd   :  { %v178_v17 = vadd.f32 -1.4531521, %v176_v15  ;;  %v185_v18 = vadd.f32 -0.28449672, %v183_v16 }
  0xdf   :  { %v180_v20 = vmul.f32 %v298_v12, %v178_v17  ;;  %v187_v21 = vmul.f32 %v296_v4, %v185_v18 }
  0xe1   :  { %v182_v22 = vadd.f32 1.4214138, %v180_v20  ;;  %v189_v23 = vadd.f32 0.2548296, %v187_v21 }
  0xe3   :  { %v184_v25 = vmul.f32 %v298_v12, %v182_v22  ;;  %v191_v26 = vmul.f32 %v296_v4, %v189_v23 }
  0xe5   :  { %v186_v28 = vadd.f32 -0.28449672, %v184_v25  ;;  %v201_v29 = vmul.f32 %v300_v27, %v191_v26 }
  0xe7   :  { %v188_v30 = vmul.f32 %v298_v12, %v186_v28  ;;  %v203_v31 = vsub.f32 1.0, %v201_v29 }
  0xe9   :  { %v190_v34 = vadd.f32 0.2548296, %v188_v30  ;;  %v205_v35 = vmul.f32 %v203_v31, %v165_v33 }
  0xeb   :  { %v192_v37 = vmul.f32 %v298_v12, %v190_v34  ;;  %v207_v38 = vadd.f32 1.0, %v205_v35 }
  0xed   :  { %v202_v40 = vmul.f32 %v302_v39, %v192_v37  ;;  %v209_v41 = vmul.f32 %v207_v38, %v159_v36 }
  0xef   :  { %v204_v42 = vsub.f32 1.0, %v202_v40  ;;  %211 = vst.msk [vmem:[#allocation10] sm:$0xff] %vm71_vm0, %v209_v41 }
  0xf1   :  { %v206_v44 = vmul.f32 %v204_v42, %v166_v43 }
  0xf3   :  { %v208_v46 = vadd.f32 1.0, %v206_v44 }
  0xf5   :  { %v210_v47 = vmul.f32 %v208_v46, %v160_v45 }
  0xf7   :  { %212 = vst.msk [vmem:[#allocation10 + $0x8] sm:$0xff] %vm71_vm0, %v210_v47 }
  0xf8   :  { %225 = dma.vmem_to_hbm [thread:$0]  %s218_s14, 256, %s220_s17, [#allocation5], %s397_s27, %s397_s27, %s398_s28  }
  0xf9   :  { %393 = dma.done.wait [#allocation5], 256  }
  0xfa   :  { %394 = vsyncadd [#allocation5], 4294967040 }
  0xfb   :  { %230 = vsyncpa [#allocation4], 1 }
  0xfc   :  { %231 = vsyncpa [#allocation9], 1 }
  0xfd   :  { %232 = vsyncpa [#allocation5], 1 }
  0xfe   :  { %233 = vsyncpa [#allocation6], 1 }

</bundles_post_ra>
